<compile_context>
chip_gen: v7x
topology: tpu7x:2x2x1
jax: 0.10.0
libtpu: 0.0.40
codegen_flags: <defaults>
</compile_context>

<pallas_src>
import functools
import math

import jax
import jax.numpy as jnp
from jax.experimental import pallas as pl
from jax.experimental.pallas import tpu as pltpu


def _round_up(x: int, m: int) -> int:
    return -(-x // m) * m


def _embedding_gather_kernel(ids_ref, table_hbm, o_ref, row_buf, row_sems, *,
                             rows, n_tokens, scale):
    """Gather `rows` embedding rows via per-row HBM->VMEM DMAs, scale, store."""
    base = pl.program_id(0) * rows
    vocab = table_hbm.shape[0]

    def _row_copy(r):
        # Clamp the token index so the tail block never reads ids out of
        # bounds, and clamp the row id so a bad/OOB token id can never drive
        # an out-of-bounds HBM DMA.
        # TODO(synk): nn.Embedding raises on out-of-range ids; here they are
        # clamped to [0, vocab) instead of surfaced.
        tok = jnp.minimum(base + r, n_tokens - 1)
        row_id = jnp.clip(ids_ref[tok], 0, vocab - 1)
        return pltpu.make_async_copy(
            table_hbm.at[pl.ds(row_id, 1), :],   # (1, d_model) row in HBM
            row_buf.at[pl.ds(r, 1), :],          # (1, d_model) slot in VMEM
            row_sems.at[r],
        )

    copies = [_row_copy(r) for r in range(rows)]
    # Issue all row DMAs back-to-back so they are in flight concurrently ...
    for c in copies:
        c.start()
    # ... then drain them.
    for c in copies:
        c.wait()

    # Single lane-dense (rows, d_model) store; sqrt(d_model) is a constant.
    o_ref[...] = (row_buf[...].astype(jnp.float32) * scale).astype(o_ref.dtype)


def input_embedding(token_ids, table, *, rows_per_step: int = 32):
    """Pallas equivalent of `nn.Embedding(vocab, d_model)(x) * sqrt(d_model)`."""
    vocab_size, d_model = table.shape
    lead = token_ids.shape
    ids = token_ids.reshape(-1).astype(jnp.int32)
    n_tokens = int(ids.shape[0])

    # Rows gathered per grid step: multiple of 8 (sublane), capped by N.
    rows = max(8, min(rows_per_step, _round_up(n_tokens, 8)))
    grid = pl.cdiv(n_tokens, rows)
    scale = float(math.sqrt(d_model))
    itemsize = jnp.dtype(table.dtype).itemsize

    cost = pl.CostEstimate(
        flops=n_tokens * d_model,                 # the scale multiply
        transcendentals=0,
        bytes_accessed=2 * n_tokens * d_model * itemsize + n_tokens * 4,
    )

    out = pl.pallas_call(
        functools.partial(_embedding_gather_kernel,
                          rows=rows, n_tokens=n_tokens, scale=scale),
        out_shape=jax.ShapeDtypeStruct((n_tokens, d_model), table.dtype),
        grid_spec=pltpu.PrefetchScalarGridSpec(
            num_scalar_prefetch=1,                       # ids -> SMEM
            grid=(grid,),
            in_specs=[pl.BlockSpec(memory_space=pl.ANY)],  # table stays in HBM
            out_specs=pl.BlockSpec((rows, d_model), lambda i, ids: (i, 0)),
            scratch_shapes=[
                pltpu.VMEM((rows, d_model), table.dtype),  # gathered rows
                pltpu.SemaphoreType.DMA((rows,)),          # one sem per row DMA
            ],
        ),
        compiler_params=pltpu.CompilerParams(
            dimension_semantics=("parallel",),     # token axis -> both TCs on v7x
            vmem_limit_bytes=32 * 1024 * 1024,
        ),
        cost_estimate=cost,
    )(ids, table)

    return out.reshape(*lead, d_model)


if __name__ == "__main__":
    B, S = 2, 8
    d_model, vocab_size = 32, 128

    root = jax.random.PRNGKey(0)
    k_ids, k_tbl = jax.random.split(root)
    token_ids = jax.random.randint(k_ids, (B, S), 0, vocab_size, dtype=jnp.int32)
    table = jax.random.normal(k_tbl, (vocab_size, d_model), jnp.float32)

    fwd = jax.jit(input_embedding)
    out = fwd(token_ids, table)
    jax.block_until_ready(out)

    # Pure-JAX reference: embedding lookup * sqrt(d_model).
    ref = table[token_ids] * math.sqrt(d_model)

    assert out.shape == (B, S, d_model)
    assert bool(jnp.all(jnp.isfinite(out)))
    # DMA gather is bit-exact; tolerance is only insurance.
    assert jnp.allclose(out, ref, rtol=1e-6, atol=1e-6), float(
        jnp.max(jnp.abs(out - ref)))
    print("KERNEL_OK")
</pallas_src>

<mosaic_0001>
module attributes {stable_mosaic.version = 11 : i64} {
  func.func @_embedding_gather_kernel(%arg0: i32, %arg1: memref<16xi32, #tpu.memory_space<smem>>, %arg2: memref<128x32xf32, #tpu.memory_space<any>>, %arg3: memref<16x32xf32, #tpu.memory_space<vmem>>, %arg4: memref<16x32xf32, #tpu.memory_space<vmem>>, %arg5: memref<16x!tpu.dma_semaphore, #tpu.memory_space<semaphore_mem>>) attributes {dimension_semantics = [#tpu.dimension_semantics<parallel>], iteration_bounds = array<i64: 1>, scalar_prefetch = 1 : i64, scratch_operands = 2 : i64, tpu.core_type = #tpu.core_type<tc>, window_params = [{}, {transform_indices = @transform_1, window_bounds = array<i64: 16, 32>}]} {
    %c16_i32 = arith.constant 16 : i32
    %0 = arith.muli %arg0, %c16_i32 : i32
    %c0_i32 = arith.constant 0 : i32
    %1 = arith.addi %0, %c0_i32 : i32
    %c15_i32 = arith.constant 15 : i32
    %2 = arith.minsi %1, %c15_i32 : i32
    %3 = arith.index_cast %2 : i32 to index
    %4 = memref.load %arg1[%3] : memref<16xi32, #tpu.memory_space<smem>>
    %c0_i32_0 = arith.constant 0 : i32
    %c127_i32 = arith.constant 127 : i32
    %5 = arith.maxsi %c0_i32_0, %4 : i32
    %6 = arith.minsi %c127_i32, %5 : i32
    %c1_i32 = arith.constant 1 : i32
    %7 = arith.addi %0, %c1_i32 : i32
    %c15_i32_1 = arith.constant 15 : i32
    %8 = arith.minsi %7, %c15_i32_1 : i32
    %9 = arith.index_cast %8 : i32 to index
    %10 = memref.load %arg1[%9] : memref<16xi32, #tpu.memory_space<smem>>
    %c0_i32_2 = arith.constant 0 : i32
    %c127_i32_3 = arith.constant 127 : i32
    %11 = arith.maxsi %c0_i32_2, %10 : i32
    %12 = arith.minsi %c127_i32_3, %11 : i32
    %c2_i32 = arith.constant 2 : i32
    %13 = arith.addi %0, %c2_i32 : i32
    %c15_i32_4 = arith.constant 15 : i32
    %14 = arith.minsi %13, %c15_i32_4 : i32
    %15 = arith.index_cast %14 : i32 to index
    %16 = memref.load %arg1[%15] : memref<16xi32, #tpu.memory_space<smem>>
    %c0_i32_5 = arith.constant 0 : i32
    %c127_i32_6 = arith.constant 127 : i32
    %17 = arith.maxsi %c0_i32_5, %16 : i32
    %18 = arith.minsi %c127_i32_6, %17 : i32
    %c3_i32 = arith.constant 3 : i32
    %19 = arith.addi %0, %c3_i32 : i32
    %c15_i32_7 = arith.constant 15 : i32
    %20 = arith.minsi %19, %c15_i32_7 : i32
    %21 = arith.index_cast %20 : i32 to index
    %22 = memref.load %arg1[%21] : memref<16xi32, #tpu.memory_space<smem>>
    %c0_i32_8 = arith.constant 0 : i32
    %c127_i32_9 = arith.constant 127 : i32
    %23 = arith.maxsi %c0_i32_8, %22 : i32
    %24 = arith.minsi %c127_i32_9, %23 : i32
    %c4_i32 = arith.constant 4 : i32
    %25 = arith.addi %0, %c4_i32 : i32
    %c15_i32_10 = arith.constant 15 : i32
    %26 = arith.minsi %25, %c15_i32_10 : i32
    %27 = arith.index_cast %26 : i32 to index
    %28 = memref.load %arg1[%27] : memref<16xi32, #tpu.memory_space<smem>>
    %c0_i32_11 = arith.constant 0 : i32
    %c127_i32_12 = arith.constant 127 : i32
    %29 = arith.maxsi %c0_i32_11, %28 : i32
    %30 = arith.minsi %c127_i32_12, %29 : i32
    %c5_i32 = arith.constant 5 : i32
    %31 = arith.addi %0, %c5_i32 : i32
    %c15_i32_13 = arith.constant 15 : i32
    %32 = arith.minsi %31, %c15_i32_13 : i32
    %33 = arith.index_cast %32 : i32 to index
    %34 = memref.load %arg1[%33] : memref<16xi32, #tpu.memory_space<smem>>
    %c0_i32_14 = arith.constant 0 : i32
    %c127_i32_15 = arith.constant 127 : i32
    %35 = arith.maxsi %c0_i32_14, %34 : i32
    %36 = arith.minsi %c127_i32_15, %35 : i32
    %c6_i32 = arith.constant 6 : i32
    %37 = arith.addi %0, %c6_i32 : i32
    %c15_i32_16 = arith.constant 15 : i32
    %38 = arith.minsi %37, %c15_i32_16 : i32
    %39 = arith.index_cast %38 : i32 to index
    %40 = memref.load %arg1[%39] : memref<16xi32, #tpu.memory_space<smem>>
    %c0_i32_17 = arith.constant 0 : i32
    %c127_i32_18 = arith.constant 127 : i32
    %41 = arith.maxsi %c0_i32_17, %40 : i32
    %42 = arith.minsi %c127_i32_18, %41 : i32
    %c7_i32 = arith.constant 7 : i32
    %43 = arith.addi %0, %c7_i32 : i32
    %c15_i32_19 = arith.constant 15 : i32
    %44 = arith.minsi %43, %c15_i32_19 : i32
    %45 = arith.index_cast %44 : i32 to index
    %46 = memref.load %arg1[%45] : memref<16xi32, #tpu.memory_space<smem>>
    %c0_i32_20 = arith.constant 0 : i32
    %c127_i32_21 = arith.constant 127 : i32
    %47 = arith.maxsi %c0_i32_20, %46 : i32
    %48 = arith.minsi %c127_i32_21, %47 : i32
    %c8_i32 = arith.constant 8 : i32
    %49 = arith.addi %0, %c8_i32 : i32
    %c15_i32_22 = arith.constant 15 : i32
    %50 = arith.minsi %49, %c15_i32_22 : i32
    %51 = arith.index_cast %50 : i32 to index
    %52 = memref.load %arg1[%51] : memref<16xi32, #tpu.memory_space<smem>>
    %c0_i32_23 = arith.constant 0 : i32
    %c127_i32_24 = arith.constant 127 : i32
    %53 = arith.maxsi %c0_i32_23, %52 : i32
    %54 = arith.minsi %c127_i32_24, %53 : i32
    %c9_i32 = arith.constant 9 : i32
    %55 = arith.addi %0, %c9_i32 : i32
    %c15_i32_25 = arith.constant 15 : i32
    %56 = arith.minsi %55, %c15_i32_25 : i32
    %57 = arith.index_cast %56 : i32 to index
    %58 = memref.load %arg1[%57] : memref<16xi32, #tpu.memory_space<smem>>
    %c0_i32_26 = arith.constant 0 : i32
    %c127_i32_27 = arith.constant 127 : i32
    %59 = arith.maxsi %c0_i32_26, %58 : i32
    %60 = arith.minsi %c127_i32_27, %59 : i32
    %c10_i32 = arith.constant 10 : i32
    %61 = arith.addi %0, %c10_i32 : i32
    %c15_i32_28 = arith.constant 15 : i32
    %62 = arith.minsi %61, %c15_i32_28 : i32
    %63 = arith.index_cast %62 : i32 to index
    %64 = memref.load %arg1[%63] : memref<16xi32, #tpu.memory_space<smem>>
    %c0_i32_29 = arith.constant 0 : i32
    %c127_i32_30 = arith.constant 127 : i32
    %65 = arith.maxsi %c0_i32_29, %64 : i32
    %66 = arith.minsi %c127_i32_30, %65 : i32
    %c11_i32 = arith.constant 11 : i32
    %67 = arith.addi %0, %c11_i32 : i32
    %c15_i32_31 = arith.constant 15 : i32
    %68 = arith.minsi %67, %c15_i32_31 : i32
    %69 = arith.index_cast %68 : i32 to index
    %70 = memref.load %arg1[%69] : memref<16xi32, #tpu.memory_space<smem>>
    %c0_i32_32 = arith.constant 0 : i32
    %c127_i32_33 = arith.constant 127 : i32
    %71 = arith.maxsi %c0_i32_32, %70 : i32
    %72 = arith.minsi %c127_i32_33, %71 : i32
    %c12_i32 = arith.constant 12 : i32
    %73 = arith.addi %0, %c12_i32 : i32
    %c15_i32_34 = arith.constant 15 : i32
    %74 = arith.minsi %73, %c15_i32_34 : i32
    %75 = arith.index_cast %74 : i32 to index
    %76 = memref.load %arg1[%75] : memref<16xi32, #tpu.memory_space<smem>>
    %c0_i32_35 = arith.constant 0 : i32
    %c127_i32_36 = arith.constant 127 : i32
    %77 = arith.maxsi %c0_i32_35, %76 : i32
    %78 = arith.minsi %c127_i32_36, %77 : i32
    %c13_i32 = arith.constant 13 : i32
    %79 = arith.addi %0, %c13_i32 : i32
    %c15_i32_37 = arith.constant 15 : i32
    %80 = arith.minsi %79, %c15_i32_37 : i32
    %81 = arith.index_cast %80 : i32 to index
    %82 = memref.load %arg1[%81] : memref<16xi32, #tpu.memory_space<smem>>
    %c0_i32_38 = arith.constant 0 : i32
    %c127_i32_39 = arith.constant 127 : i32
    %83 = arith.maxsi %c0_i32_38, %82 : i32
    %84 = arith.minsi %c127_i32_39, %83 : i32
    %c14_i32 = arith.constant 14 : i32
    %85 = arith.addi %0, %c14_i32 : i32
    %c15_i32_40 = arith.constant 15 : i32
    %86 = arith.minsi %85, %c15_i32_40 : i32
    %87 = arith.index_cast %86 : i32 to index
    %88 = memref.load %arg1[%87] : memref<16xi32, #tpu.memory_space<smem>>
    %c0_i32_41 = arith.constant 0 : i32
    %c127_i32_42 = arith.constant 127 : i32
    %89 = arith.maxsi %c0_i32_41, %88 : i32
    %90 = arith.minsi %c127_i32_42, %89 : i32
    %c15_i32_43 = arith.constant 15 : i32
    %91 = arith.addi %0, %c15_i32_43 : i32
    %c15_i32_44 = arith.constant 15 : i32
    %92 = arith.minsi %91, %c15_i32_44 : i32
    %93 = arith.index_cast %92 : i32 to index
    %94 = memref.load %arg1[%93] : memref<16xi32, #tpu.memory_space<smem>>
    %c0_i32_45 = arith.constant 0 : i32
    %c127_i32_46 = arith.constant 127 : i32
    %95 = arith.maxsi %c0_i32_45, %94 : i32
    %96 = arith.minsi %c127_i32_46, %95 : i32
    %c0_i32_47 = arith.constant 0 : i32
    %c0_i32_48 = arith.constant 0 : i32
    %97 = tpu.memref_slice %arg2[%6, %c0_i32_48] : memref<128x32xf32, #tpu.memory_space<any>> -> memref<1x32xf32, #tpu.memory_space<any>>
    %c0_i32_49 = arith.constant 0 : i32
    %c0_i32_50 = arith.constant 0 : i32
    %98 = tpu.memref_slice %arg4[%c0_i32_49, %c0_i32_50] : memref<16x32xf32, #tpu.memory_space<vmem>> -> memref<1x32xf32, #tpu.memory_space<vmem>>
    %99 = tpu.memref_slice %arg5[%c0_i32_47] : memref<16x!tpu.dma_semaphore, #tpu.memory_space<semaphore_mem>> -> memref<1x!tpu.dma_semaphore, #tpu.memory_space<semaphore_mem>>
    %100 = tpu.memref_squeeze %99 : memref<1x!tpu.dma_semaphore, #tpu.memory_space<semaphore_mem>> -> memref<!tpu.dma_semaphore, #tpu.memory_space<semaphore_mem>>
    tpu.enqueue_dma source(%97 : memref<1x32xf32, #tpu.memory_space<any>>) target(%98 : memref<1x32xf32, #tpu.memory_space<vmem>>) target_semaphore(%100 : memref<!tpu.dma_semaphore, #tpu.memory_space<semaphore_mem>>)
    %c1_i32_51 = arith.constant 1 : i32
    %c0_i32_52 = arith.constant 0 : i32
    %101 = tpu.memref_slice %arg2[%12, %c0_i32_52] : memref<128x32xf32, #tpu.memory_space<any>> -> memref<1x32xf32, #tpu.memory_space<any>>
    %c1_i32_53 = arith.constant 1 : i32
    %c0_i32_54 = arith.constant 0 : i32
    %102 = tpu.memref_slice %arg4[%c1_i32_53, %c0_i32_54] : memref<16x32xf32, #tpu.memory_space<vmem>> -> memref<1x32xf32, #tpu.memory_space<vmem>>
    %103 = tpu.memref_slice %arg5[%c1_i32_51] : memref<16x!tpu.dma_semaphore, #tpu.memory_space<semaphore_mem>> -> memref<1x!tpu.dma_semaphore, #tpu.memory_space<semaphore_mem>>
    %104 = tpu.memref_squeeze %103 : memref<1x!tpu.dma_semaphore, #tpu.memory_space<semaphore_mem>> -> memref<!tpu.dma_semaphore, #tpu.memory_space<semaphore_mem>>
    tpu.enqueue_dma source(%101 : memref<1x32xf32, #tpu.memory_space<any>>) target(%102 : memref<1x32xf32, #tpu.memory_space<vmem>>) target_semaphore(%104 : memref<!tpu.dma_semaphore, #tpu.memory_space<semaphore_mem>>)
    %c2_i32_55 = arith.constant 2 : i32
    %c0_i32_56 = arith.constant 0 : i32
    %105 = tpu.memref_slice %arg2[%18, %c0_i32_56] : memref<128x32xf32, #tpu.memory_space<any>> -> memref<1x32xf32, #tpu.memory_space<any>>
    %c2_i32_57 = arith.constant 2 : i32
    %c0_i32_58 = arith.constant 0 : i32
    %106 = tpu.memref_slice %arg4[%c2_i32_57, %c0_i32_58] : memref<16x32xf32, #tpu.memory_space<vmem>> -> memref<1x32xf32, #tpu.memory_space<vmem>>
    %107 = tpu.memref_slice %arg5[%c2_i32_55] : memref<16x!tpu.dma_semaphore, #tpu.memory_space<semaphore_mem>> -> memref<1x!tpu.dma_semaphore, #tpu.memory_space<semaphore_mem>>
    %108 = tpu.memref_squeeze %107 : memref<1x!tpu.dma_semaphore, #tpu.memory_space<semaphore_mem>> -> memref<!tpu.dma_semaphore, #tpu.memory_space<semaphore_mem>>
    tpu.enqueue_dma source(%105 : memref<1x32xf32, #tpu.memory_space<any>>) target(%106 : memref<1x32xf32, #tpu.memory_space<vmem>>) target_semaphore(%108 : memref<!tpu.dma_semaphore, #tpu.memory_space<semaphore_mem>>)
    %c3_i32_59 = arith.constant 3 : i32
    %c0_i32_60 = arith.constant 0 : i32
    %109 = tpu.memref_slice %arg2[%24, %c0_i32_60] : memref<128x32xf32, #tpu.memory_space<any>> -> memref<1x32xf32, #tpu.memory_space<any>>
    %c3_i32_61 = arith.constant 3 : i32
    %c0_i32_62 = arith.constant 0 : i32
    %110 = tpu.memref_slice %arg4[%c3_i32_61, %c0_i32_62] : memref<16x32xf32, #tpu.memory_space<vmem>> -> memref<1x32xf32, #tpu.memory_space<vmem>>
    %111 = tpu.memref_slice %arg5[%c3_i32_59] : memref<16x!tpu.dma_semaphore, #tpu.memory_space<semaphore_mem>> -> memref<1x!tpu.dma_semaphore, #tpu.memory_space<semaphore_mem>>
    %112 = tpu.memref_squeeze %111 : memref<1x!tpu.dma_semaphore, #tpu.memory_space<semaphore_mem>> -> memref<!tpu.dma_semaphore, #tpu.memory_space<semaphore_mem>>
    tpu.enqueue_dma source(%109 : memref<1x32xf32, #tpu.memory_space<any>>) target(%110 : memref<1x32xf32, #tpu.memory_space<vmem>>) target_semaphore(%112 : memref<!tpu.dma_semaphore, #tpu.memory_space<semaphore_mem>>)
    %c4_i32_63 = arith.constant 4 : i32
    %c0_i32_64 = arith.constant 0 : i32
    %113 = tpu.memref_slice %arg2[%30, %c0_i32_64] : memref<128x32xf32, #tpu.memory_space<any>> -> memref<1x32xf32, #tpu.memory_space<any>>
    %c4_i32_65 = arith.constant 4 : i32
    %c0_i32_66 = arith.constant 0 : i32
    %114 = tpu.memref_slice %arg4[%c4_i32_65, %c0_i32_66] : memref<16x32xf32, #tpu.memory_space<vmem>> -> memref<1x32xf32, #tpu.memory_space<vmem>>
    %115 = tpu.memref_slice %arg5[%c4_i32_63] : memref<16x!tpu.dma_semaphore, #tpu.memory_space<semaphore_mem>> -> memref<1x!tpu.dma_semaphore, #tpu.memory_space<semaphore_mem>>
    %116 = tpu.memref_squeeze %115 : memref<1x!tpu.dma_semaphore, #tpu.memory_space<semaphore_mem>> -> memref<!tpu.dma_semaphore, #tpu.memory_space<semaphore_mem>>
    tpu.enqueue_dma source(%113 : memref<1x32xf32, #tpu.memory_space<any>>) target(%114 : memref<1x32xf32, #tpu.memory_space<vmem>>) target_semaphore(%116 : memref<!tpu.dma_semaphore, #tpu.memory_space<semaphore_mem>>)
    %c5_i32_67 = arith.constant 5 : i32
    %c0_i32_68 = arith.constant 0 : i32
    %117 = tpu.memref_slice %arg2[%36, %c0_i32_68] : memref<128x32xf32, #tpu.memory_space<any>> -> memref<1x32xf32, #tpu.memory_space<any>>
    %c5_i32_69 = arith.constant 5 : i32
    %c0_i32_70 = arith.constant 0 : i32
    %118 = tpu.memref_slice %arg4[%c5_i32_69, %c0_i32_70] : memref<16x32xf32, #tpu.memory_space<vmem>> -> memref<1x32xf32, #tpu.memory_space<vmem>>
    %119 = tpu.memref_slice %arg5[%c5_i32_67] : memref<16x!tpu.dma_semaphore, #tpu.memory_space<semaphore_mem>> -> memref<1x!tpu.dma_semaphore, #tpu.memory_space<semaphore_mem>>
    %120 = tpu.memref_squeeze %119 : memref<1x!tpu.dma_semaphore, #tpu.memory_space<semaphore_mem>> -> memref<!tpu.dma_semaphore, #tpu.memory_space<semaphore_mem>>
    tpu.enqueue_dma source(%117 : memref<1x32xf32, #tpu.memory_space<any>>) target(%118 : memref<1x32xf32, #tpu.memory_space<vmem>>) target_semaphore(%120 : memref<!tpu.dma_semaphore, #tpu.memory_space<semaphore_mem>>)
    %c6_i32_71 = arith.constant 6 : i32
    %c0_i32_72 = arith.constant 0 : i32
    %121 = tpu.memref_slice %arg2[%42, %c0_i32_72] : memref<128x32xf32, #tpu.memory_space<any>> -> memref<1x32xf32, #tpu.memory_space<any>>
    %c6_i32_73 = arith.constant 6 : i32
    %c0_i32_74 = arith.constant 0 : i32
    %122 = tpu.memref_slice %arg4[%c6_i32_73, %c0_i32_74] : memref<16x32xf32, #tpu.memory_space<vmem>> -> memref<1x32xf32, #tpu.memory_space<vmem>>
    %123 = tpu.memref_slice %arg5[%c6_i32_71] : memref<16x!tpu.dma_semaphore, #tpu.memory_space<semaphore_mem>> -> memref<1x!tpu.dma_semaphore, #tpu.memory_space<semaphore_mem>>
    %124 = tpu.memref_squeeze %123 : memref<1x!tpu.dma_semaphore, #tpu.memory_space<semaphore_mem>> -> memref<!tpu.dma_semaphore, #tpu.memory_space<semaphore_mem>>
    tpu.enqueue_dma source(%121 : memref<1x32xf32, #tpu.memory_space<any>>) target(%122 : memref<1x32xf32, #tpu.memory_space<vmem>>) target_semaphore(%124 : memref<!tpu.dma_semaphore, #tpu.memory_space<semaphore_mem>>)
    %c7_i32_75 = arith.constant 7 : i32
    %c0_i32_76 = arith.constant 0 : i32
    %125 = tpu.memref_slice %arg2[%48, %c0_i32_76] : memref<128x32xf32, #tpu.memory_space<any>> -> memref<1x32xf32, #tpu.memory_space<any>>
    %c7_i32_77 = arith.constant 7 : i32
    %c0_i32_78 = arith.constant 0 : i32
    %126 = tpu.memref_slice %arg4[%c7_i32_77, %c0_i32_78] : memref<16x32xf32, #tpu.memory_space<vmem>> -> memref<1x32xf32, #tpu.memory_space<vmem>>
    %127 = tpu.memref_slice %arg5[%c7_i32_75] : memref<16x!tpu.dma_semaphore, #tpu.memory_space<semaphore_mem>> -> memref<1x!tpu.dma_semaphore, #tpu.memory_space<semaphore_mem>>
    %128 = tpu.memref_squeeze %127 : memref<1x!tpu.dma_semaphore, #tpu.memory_space<semaphore_mem>> -> memref<!tpu.dma_semaphore, #tpu.memory_space<semaphore_mem>>
    tpu.enqueue_dma source(%125 : memref<1x32xf32, #tpu.memory_space<any>>) target(%126 : memref<1x32xf32, #tpu.memory_space<vmem>>) target_semaphore(%128 : memref<!tpu.dma_semaphore, #tpu.memory_space<semaphore_mem>>)
    %c8_i32_79 = arith.constant 8 : i32
    %c0_i32_80 = arith.constant 0 : i32
    %129 = tpu.memref_slice %arg2[%54, %c0_i32_80] : memref<128x32xf32, #tpu.memory_space<any>> -> memref<1x32xf32, #tpu.memory_space<any>>
    %c8_i32_81 = arith.constant 8 : i32
    %c0_i32_82 = arith.constant 0 : i32
    %130 = tpu.memref_slice %arg4[%c8_i32_81, %c0_i32_82] : memref<16x32xf32, #tpu.memory_space<vmem>> -> memref<1x32xf32, #tpu.memory_space<vmem>>
    %131 = tpu.memref_slice %arg5[%c8_i32_79] : memref<16x!tpu.dma_semaphore, #tpu.memory_space<semaphore_mem>> -> memref<1x!tpu.dma_semaphore, #tpu.memory_space<semaphore_mem>>
    %132 = tpu.memref_squeeze %131 : memref<1x!tpu.dma_semaphore, #tpu.memory_space<semaphore_mem>> -> memref<!tpu.dma_semaphore, #tpu.memory_space<semaphore_mem>>
    tpu.enqueue_dma source(%129 : memref<1x32xf32, #tpu.memory_space<any>>) target(%130 : memref<1x32xf32, #tpu.memory_space<vmem>>) target_semaphore(%132 : memref<!tpu.dma_semaphore, #tpu.memory_space<semaphore_mem>>)
    %c9_i32_83 = arith.constant 9 : i32
    %c0_i32_84 = arith.constant 0 : i32
    %133 = tpu.memref_slice %arg2[%60, %c0_i32_84] : memref<128x32xf32, #tpu.memory_space<any>> -> memref<1x32xf32, #tpu.memory_space<any>>
    %c9_i32_85 = arith.constant 9 : i32
    %c0_i32_86 = arith.constant 0 : i32
    %134 = tpu.memref_slice %arg4[%c9_i32_85, %c0_i32_86] : memref<16x32xf32, #tpu.memory_space<vmem>> -> memref<1x32xf32, #tpu.memory_space<vmem>>
    %135 = tpu.memref_slice %arg5[%c9_i32_83] : memref<16x!tpu.dma_semaphore, #tpu.memory_space<semaphore_mem>> -> memref<1x!tpu.dma_semaphore, #tpu.memory_space<semaphore_mem>>
    %136 = tpu.memref_squeeze %135 : memref<1x!tpu.dma_semaphore, #tpu.memory_space<semaphore_mem>> -> memref<!tpu.dma_semaphore, #tpu.memory_space<semaphore_mem>>
    tpu.enqueue_dma source(%133 : memref<1x32xf32, #tpu.memory_space<any>>) target(%134 : memref<1x32xf32, #tpu.memory_space<vmem>>) target_semaphore(%136 : memref<!tpu.dma_semaphore, #tpu.memory_space<semaphore_mem>>)
    %c10_i32_87 = arith.constant 10 : i32
    %c0_i32_88 = arith.constant 0 : i32
    %137 = tpu.memref_slice %arg2[%66, %c0_i32_88] : memref<128x32xf32, #tpu.memory_space<any>> -> memref<1x32xf32, #tpu.memory_space<any>>
    %c10_i32_89 = arith.constant 10 : i32
    %c0_i32_90 = arith.constant 0 : i32
    %138 = tpu.memref_slice %arg4[%c10_i32_89, %c0_i32_90] : memref<16x32xf32, #tpu.memory_space<vmem>> -> memref<1x32xf32, #tpu.memory_space<vmem>>
    %139 = tpu.memref_slice %arg5[%c10_i32_87] : memref<16x!tpu.dma_semaphore, #tpu.memory_space<semaphore_mem>> -> memref<1x!tpu.dma_semaphore, #tpu.memory_space<semaphore_mem>>
    %140 = tpu.memref_squeeze %139 : memref<1x!tpu.dma_semaphore, #tpu.memory_space<semaphore_mem>> -> memref<!tpu.dma_semaphore, #tpu.memory_space<semaphore_mem>>
    tpu.enqueue_dma source(%137 : memref<1x32xf32, #tpu.memory_space<any>>) target(%138 : memref<1x32xf32, #tpu.memory_space<vmem>>) target_semaphore(%140 : memref<!tpu.dma_semaphore, #tpu.memory_space<semaphore_mem>>)
    %c11_i32_91 = arith.constant 11 : i32
    %c0_i32_92 = arith.constant 0 : i32
    %141 = tpu.memref_slice %arg2[%72, %c0_i32_92] : memref<128x32xf32, #tpu.memory_space<any>> -> memref<1x32xf32, #tpu.memory_space<any>>
    %c11_i32_93 = arith.constant 11 : i32
    %c0_i32_94 = arith.constant 0 : i32
    %142 = tpu.memref_slice %arg4[%c11_i32_93, %c0_i32_94] : memref<16x32xf32, #tpu.memory_space<vmem>> -> memref<1x32xf32, #tpu.memory_space<vmem>>
    %143 = tpu.memref_slice %arg5[%c11_i32_91] : memref<16x!tpu.dma_semaphore, #tpu.memory_space<semaphore_mem>> -> memref<1x!tpu.dma_semaphore, #tpu.memory_space<semaphore_mem>>
    %144 = tpu.memref_squeeze %143 : memref<1x!tpu.dma_semaphore, #tpu.memory_space<semaphore_mem>> -> memref<!tpu.dma_semaphore, #tpu.memory_space<semaphore_mem>>
    tpu.enqueue_dma source(%141 : memref<1x32xf32, #tpu.memory_space<any>>) target(%142 : memref<1x32xf32, #tpu.memory_space<vmem>>) target_semaphore(%144 : memref<!tpu.dma_semaphore, #tpu.memory_space<semaphore_mem>>)
    %c12_i32_95 = arith.constant 12 : i32
    %c0_i32_96 = arith.constant 0 : i32
    %145 = tpu.memref_slice %arg2[%78, %c0_i32_96] : memref<128x32xf32, #tpu.memory_space<any>> -> memref<1x32xf32, #tpu.memory_space<any>>
    %c12_i32_97 = arith.constant 12 : i32
    %c0_i32_98 = arith.constant 0 : i32
    %146 = tpu.memref_slice %arg4[%c12_i32_97, %c0_i32_98] : memref<16x32xf32, #tpu.memory_space<vmem>> -> memref<1x32xf32, #tpu.memory_space<vmem>>
    %147 = tpu.memref_slice %arg5[%c12_i32_95] : memref<16x!tpu.dma_semaphore, #tpu.memory_space<semaphore_mem>> -> memref<1x!tpu.dma_semaphore, #tpu.memory_space<semaphore_mem>>
    %148 = tpu.memref_squeeze %147 : memref<1x!tpu.dma_semaphore, #tpu.memory_space<semaphore_mem>> -> memref<!tpu.dma_semaphore, #tpu.memory_space<semaphore_mem>>
    tpu.enqueue_dma source(%145 : memref<1x32xf32, #tpu.memory_space<any>>) target(%146 : memref<1x32xf32, #tpu.memory_space<vmem>>) target_semaphore(%148 : memref<!tpu.dma_semaphore, #tpu.memory_space<semaphore_mem>>)
    %c13_i32_99 = arith.constant 13 : i32
    %c0_i32_100 = arith.constant 0 : i32
    %149 = tpu.memref_slice %arg2[%84, %c0_i32_100] : memref<128x32xf32, #tpu.memory_space<any>> -> memref<1x32xf32, #tpu.memory_space<any>>
    %c13_i32_101 = arith.constant 13 : i32
    %c0_i32_102 = arith.constant 0 : i32
    %150 = tpu.memref_slice %arg4[%c13_i32_101, %c0_i32_102] : memref<16x32xf32, #tpu.memory_space<vmem>> -> memref<1x32xf32, #tpu.memory_space<vmem>>
    %151 = tpu.memref_slice %arg5[%c13_i32_99] : memref<16x!tpu.dma_semaphore, #tpu.memory_space<semaphore_mem>> -> memref<1x!tpu.dma_semaphore, #tpu.memory_space<semaphore_mem>>
    %152 = tpu.memref_squeeze %151 : memref<1x!tpu.dma_semaphore, #tpu.memory_space<semaphore_mem>> -> memref<!tpu.dma_semaphore, #tpu.memory_space<semaphore_mem>>
    tpu.enqueue_dma source(%149 : memref<1x32xf32, #tpu.memory_space<any>>) target(%150 : memref<1x32xf32, #tpu.memory_space<vmem>>) target_semaphore(%152 : memref<!tpu.dma_semaphore, #tpu.memory_space<semaphore_mem>>)
    %c14_i32_103 = arith.constant 14 : i32
    %c0_i32_104 = arith.constant 0 : i32
    %153 = tpu.memref_slice %arg2[%90, %c0_i32_104] : memref<128x32xf32, #tpu.memory_space<any>> -> memref<1x32xf32, #tpu.memory_space<any>>
    %c14_i32_105 = arith.constant 14 : i32
    %c0_i32_106 = arith.constant 0 : i32
    %154 = tpu.memref_slice %arg4[%c14_i32_105, %c0_i32_106] : memref<16x32xf32, #tpu.memory_space<vmem>> -> memref<1x32xf32, #tpu.memory_space<vmem>>
    %155 = tpu.memref_slice %arg5[%c14_i32_103] : memref<16x!tpu.dma_semaphore, #tpu.memory_space<semaphore_mem>> -> memref<1x!tpu.dma_semaphore, #tpu.memory_space<semaphore_mem>>
    %156 = tpu.memref_squeeze %155 : memref<1x!tpu.dma_semaphore, #tpu.memory_space<semaphore_mem>> -> memref<!tpu.dma_semaphore, #tpu.memory_space<semaphore_mem>>
    tpu.enqueue_dma source(%153 : memref<1x32xf32, #tpu.memory_space<any>>) target(%154 : memref<1x32xf32, #tpu.memory_space<vmem>>) target_semaphore(%156 : memref<!tpu.dma_semaphore, #tpu.memory_space<semaphore_mem>>)
    %c15_i32_107 = arith.constant 15 : i32
    %c0_i32_108 = arith.constant 0 : i32
    %157 = tpu.memref_slice %arg2[%96, %c0_i32_108] : memref<128x32xf32, #tpu.memory_space<any>> -> memref<1x32xf32, #tpu.memory_space<any>>
    %c15_i32_109 = arith.constant 15 : i32
    %c0_i32_110 = arith.constant 0 : i32
    %158 = tpu.memref_slice %arg4[%c15_i32_109, %c0_i32_110] : memref<16x32xf32, #tpu.memory_space<vmem>> -> memref<1x32xf32, #tpu.memory_space<vmem>>
    %159 = tpu.memref_slice %arg5[%c15_i32_107] : memref<16x!tpu.dma_semaphore, #tpu.memory_space<semaphore_mem>> -> memref<1x!tpu.dma_semaphore, #tpu.memory_space<semaphore_mem>>
    %160 = tpu.memref_squeeze %159 : memref<1x!tpu.dma_semaphore, #tpu.memory_space<semaphore_mem>> -> memref<!tpu.dma_semaphore, #tpu.memory_space<semaphore_mem>>
    tpu.enqueue_dma source(%157 : memref<1x32xf32, #tpu.memory_space<any>>) target(%158 : memref<1x32xf32, #tpu.memory_space<vmem>>) target_semaphore(%160 : memref<!tpu.dma_semaphore, #tpu.memory_space<semaphore_mem>>)
    %c0_i32_111 = arith.constant 0 : i32
    %c0_i32_112 = arith.constant 0 : i32
    %161 = tpu.memref_slice %arg2[%6, %c0_i32_112] : memref<128x32xf32, #tpu.memory_space<any>> -> memref<1x32xf32, #tpu.memory_space<any>>
    %c0_i32_113 = arith.constant 0 : i32
    %c0_i32_114 = arith.constant 0 : i32
    %162 = tpu.memref_slice %arg4[%c0_i32_113, %c0_i32_114] : memref<16x32xf32, #tpu.memory_space<vmem>> -> memref<1x32xf32, #tpu.memory_space<vmem>>
    %163 = tpu.memref_slice %arg5[%c0_i32_111] : memref<16x!tpu.dma_semaphore, #tpu.memory_space<semaphore_mem>> -> memref<1x!tpu.dma_semaphore, #tpu.memory_space<semaphore_mem>>
    %164 = tpu.memref_squeeze %163 : memref<1x!tpu.dma_semaphore, #tpu.memory_space<semaphore_mem>> -> memref<!tpu.dma_semaphore, #tpu.memory_space<semaphore_mem>>
    tpu.wait_dma2 semaphore(%164 : memref<!tpu.dma_semaphore, #tpu.memory_space<semaphore_mem>>) src(%161 : memref<1x32xf32, #tpu.memory_space<any>>) dst(%162 : memref<1x32xf32, #tpu.memory_space<vmem>>)
    %c1_i32_115 = arith.constant 1 : i32
    %c0_i32_116 = arith.constant 0 : i32
    %165 = tpu.memref_slice %arg2[%12, %c0_i32_116] : memref<128x32xf32, #tpu.memory_space<any>> -> memref<1x32xf32, #tpu.memory_space<any>>
    %c1_i32_117 = arith.constant 1 : i32
    %c0_i32_118 = arith.constant 0 : i32
    %166 = tpu.memref_slice %arg4[%c1_i32_117, %c0_i32_118] : memref<16x32xf32, #tpu.memory_space<vmem>> -> memref<1x32xf32, #tpu.memory_space<vmem>>
    %167 = tpu.memref_slice %arg5[%c1_i32_115] : memref<16x!tpu.dma_semaphore, #tpu.memory_space<semaphore_mem>> -> memref<1x!tpu.dma_semaphore, #tpu.memory_space<semaphore_mem>>
    %168 = tpu.memref_squeeze %167 : memref<1x!tpu.dma_semaphore, #tpu.memory_space<semaphore_mem>> -> memref<!tpu.dma_semaphore, #tpu.memory_space<semaphore_mem>>
    tpu.wait_dma2 semaphore(%168 : memref<!tpu.dma_semaphore, #tpu.memory_space<semaphore_mem>>) src(%165 : memref<1x32xf32, #tpu.memory_space<any>>) dst(%166 : memref<1x32xf32, #tpu.memory_space<vmem>>)
    %c2_i32_119 = arith.constant 2 : i32
    %c0_i32_120 = arith.constant 0 : i32
    %169 = tpu.memref_slice %arg2[%18, %c0_i32_120] : memref<128x32xf32, #tpu.memory_space<any>> -> memref<1x32xf32, #tpu.memory_space<any>>
    %c2_i32_121 = arith.constant 2 : i32
    %c0_i32_122 = arith.constant 0 : i32
    %170 = tpu.memref_slice %arg4[%c2_i32_121, %c0_i32_122] : memref<16x32xf32, #tpu.memory_space<vmem>> -> memref<1x32xf32, #tpu.memory_space<vmem>>
    %171 = tpu.memref_slice %arg5[%c2_i32_119] : memref<16x!tpu.dma_semaphore, #tpu.memory_space<semaphore_mem>> -> memref<1x!tpu.dma_semaphore, #tpu.memory_space<semaphore_mem>>
    %172 = tpu.memref_squeeze %171 : memref<1x!tpu.dma_semaphore, #tpu.memory_space<semaphore_mem>> -> memref<!tpu.dma_semaphore, #tpu.memory_space<semaphore_mem>>
    tpu.wait_dma2 semaphore(%172 : memref<!tpu.dma_semaphore, #tpu.memory_space<semaphore_mem>>) src(%169 : memref<1x32xf32, #tpu.memory_space<any>>) dst(%170 : memref<1x32xf32, #tpu.memory_space<vmem>>)
    %c3_i32_123 = arith.constant 3 : i32
    %c0_i32_124 = arith.constant 0 : i32
    %173 = tpu.memref_slice %arg2[%24, %c0_i32_124] : memref<128x32xf32, #tpu.memory_space<any>> -> memref<1x32xf32, #tpu.memory_space<any>>
    %c3_i32_125 = arith.constant 3 : i32
    %c0_i32_126 = arith.constant 0 : i32
    %174 = tpu.memref_slice %arg4[%c3_i32_125, %c0_i32_126] : memref<16x32xf32, #tpu.memory_space<vmem>> -> memref<1x32xf32, #tpu.memory_space<vmem>>
    %175 = tpu.memref_slice %arg5[%c3_i32_123] : memref<16x!tpu.dma_semaphore, #tpu.memory_space<semaphore_mem>> -> memref<1x!tpu.dma_semaphore, #tpu.memory_space<semaphore_mem>>
    %176 = tpu.memref_squeeze %175 : memref<1x!tpu.dma_semaphore, #tpu.memory_space<semaphore_mem>> -> memref<!tpu.dma_semaphore, #tpu.memory_space<semaphore_mem>>
    tpu.wait_dma2 semaphore(%176 : memref<!tpu.dma_semaphore, #tpu.memory_space<semaphore_mem>>) src(%173 : memref<1x32xf32, #tpu.memory_space<any>>) dst(%174 : memref<1x32xf32, #tpu.memory_space<vmem>>)
    %c4_i32_127 = arith.constant 4 : i32
    %c0_i32_128 = arith.constant 0 : i32
    %177 = tpu.memref_slice %arg2[%30, %c0_i32_128] : memref<128x32xf32, #tpu.memory_space<any>> -> memref<1x32xf32, #tpu.memory_space<any>>
    %c4_i32_129 = arith.constant 4 : i32
    %c0_i32_130 = arith.constant 0 : i32
    %178 = tpu.memref_slice %arg4[%c4_i32_129, %c0_i32_130] : memref<16x32xf32, #tpu.memory_space<vmem>> -> memref<1x32xf32, #tpu.memory_space<vmem>>
    %179 = tpu.memref_slice %arg5[%c4_i32_127] : memref<16x!tpu.dma_semaphore, #tpu.memory_space<semaphore_mem>> -> memref<1x!tpu.dma_semaphore, #tpu.memory_space<semaphore_mem>>
    %180 = tpu.memref_squeeze %179 : memref<1x!tpu.dma_semaphore, #tpu.memory_space<semaphore_mem>> -> memref<!tpu.dma_semaphore, #tpu.memory_space<semaphore_mem>>
    tpu.wait_dma2 semaphore(%180 : memref<!tpu.dma_semaphore, #tpu.memory_space<semaphore_mem>>) src(%177 : memref<1x32xf32, #tpu.memory_space<any>>) dst(%178 : memref<1x32xf32, #tpu.memory_space<vmem>>)
    %c5_i32_131 = arith.constant 5 : i32
    %c0_i32_132 = arith.constant 0 : i32
    %181 = tpu.memref_slice %arg2[%36, %c0_i32_132] : memref<128x32xf32, #tpu.memory_space<any>> -> memref<1x32xf32, #tpu.memory_space<any>>
    %c5_i32_133 = arith.constant 5 : i32
    %c0_i32_134 = arith.constant 0 : i32
    %182 = tpu.memref_slice %arg4[%c5_i32_133, %c0_i32_134] : memref<16x32xf32, #tpu.memory_space<vmem>> -> memref<1x32xf32, #tpu.memory_space<vmem>>
    %183 = tpu.memref_slice %arg5[%c5_i32_131] : memref<16x!tpu.dma_semaphore, #tpu.memory_space<semaphore_mem>> -> memref<1x!tpu.dma_semaphore, #tpu.memory_space<semaphore_mem>>
    %184 = tpu.memref_squeeze %183 : memref<1x!tpu.dma_semaphore, #tpu.memory_space<semaphore_mem>> -> memref<!tpu.dma_semaphore, #tpu.memory_space<semaphore_mem>>
    tpu.wait_dma2 semaphore(%184 : memref<!tpu.dma_semaphore, #tpu.memory_space<semaphore_mem>>) src(%181 : memref<1x32xf32, #tpu.memory_space<any>>) dst(%182 : memref<1x32xf32, #tpu.memory_space<vmem>>)
    %c6_i32_135 = arith.constant 6 : i32
    %c0_i32_136 = arith.constant 0 : i32
    %185 = tpu.memref_slice %arg2[%42, %c0_i32_136] : memref<128x32xf32, #tpu.memory_space<any>> -> memref<1x32xf32, #tpu.memory_space<any>>
    %c6_i32_137 = arith.constant 6 : i32
    %c0_i32_138 = arith.constant 0 : i32
    %186 = tpu.memref_slice %arg4[%c6_i32_137, %c0_i32_138] : memref<16x32xf32, #tpu.memory_space<vmem>> -> memref<1x32xf32, #tpu.memory_space<vmem>>
    %187 = tpu.memref_slice %arg5[%c6_i32_135] : memref<16x!tpu.dma_semaphore, #tpu.memory_space<semaphore_mem>> -> memref<1x!tpu.dma_semaphore, #tpu.memory_space<semaphore_mem>>
    %188 = tpu.memref_squeeze %187 : memref<1x!tpu.dma_semaphore, #tpu.memory_space<semaphore_mem>> -> memref<!tpu.dma_semaphore, #tpu.memory_space<semaphore_mem>>
    tpu.wait_dma2 semaphore(%188 : memref<!tpu.dma_semaphore, #tpu.memory_space<semaphore_mem>>) src(%185 : memref<1x32xf32, #tpu.memory_space<any>>) dst(%186 : memref<1x32xf32, #tpu.memory_space<vmem>>)
    %c7_i32_139 = arith.constant 7 : i32
    %c0_i32_140 = arith.constant 0 : i32
    %189 = tpu.memref_slice %arg2[%48, %c0_i32_140] : memref<128x32xf32, #tpu.memory_space<any>> -> memref<1x32xf32, #tpu.memory_space<any>>
    %c7_i32_141 = arith.constant 7 : i32
    %c0_i32_142 = arith.constant 0 : i32
    %190 = tpu.memref_slice %arg4[%c7_i32_141, %c0_i32_142] : memref<16x32xf32, #tpu.memory_space<vmem>> -> memref<1x32xf32, #tpu.memory_space<vmem>>
    %191 = tpu.memref_slice %arg5[%c7_i32_139] : memref<16x!tpu.dma_semaphore, #tpu.memory_space<semaphore_mem>> -> memref<1x!tpu.dma_semaphore, #tpu.memory_space<semaphore_mem>>
    %192 = tpu.memref_squeeze %191 : memref<1x!tpu.dma_semaphore, #tpu.memory_space<semaphore_mem>> -> memref<!tpu.dma_semaphore, #tpu.memory_space<semaphore_mem>>
    tpu.wait_dma2 semaphore(%192 : memref<!tpu.dma_semaphore, #tpu.memory_space<semaphore_mem>>) src(%189 : memref<1x32xf32, #tpu.memory_space<any>>) dst(%190 : memref<1x32xf32, #tpu.memory_space<vmem>>)
    %c8_i32_143 = arith.constant 8 : i32
    %c0_i32_144 = arith.constant 0 : i32
    %193 = tpu.memref_slice %arg2[%54, %c0_i32_144] : memref<128x32xf32, #tpu.memory_space<any>> -> memref<1x32xf32, #tpu.memory_space<any>>
    %c8_i32_145 = arith.constant 8 : i32
    %c0_i32_146 = arith.constant 0 : i32
    %194 = tpu.memref_slice %arg4[%c8_i32_145, %c0_i32_146] : memref<16x32xf32, #tpu.memory_space<vmem>> -> memref<1x32xf32, #tpu.memory_space<vmem>>
    %195 = tpu.memref_slice %arg5[%c8_i32_143] : memref<16x!tpu.dma_semaphore, #tpu.memory_space<semaphore_mem>> -> memref<1x!tpu.dma_semaphore, #tpu.memory_space<semaphore_mem>>
    %196 = tpu.memref_squeeze %195 : memref<1x!tpu.dma_semaphore, #tpu.memory_space<semaphore_mem>> -> memref<!tpu.dma_semaphore, #tpu.memory_space<semaphore_mem>>
    tpu.wait_dma2 semaphore(%196 : memref<!tpu.dma_semaphore, #tpu.memory_space<semaphore_mem>>) src(%193 : memref<1x32xf32, #tpu.memory_space<any>>) dst(%194 : memref<1x32xf32, #tpu.memory_space<vmem>>)
    %c9_i32_147 = arith.constant 9 : i32
    %c0_i32_148 = arith.constant 0 : i32
    %197 = tpu.memref_slice %arg2[%60, %c0_i32_148] : memref<128x32xf32, #tpu.memory_space<any>> -> memref<1x32xf32, #tpu.memory_space<any>>
    %c9_i32_149 = arith.constant 9 : i32
    %c0_i32_150 = arith.constant 0 : i32
    %198 = tpu.memref_slice %arg4[%c9_i32_149, %c0_i32_150] : memref<16x32xf32, #tpu.memory_space<vmem>> -> memref<1x32xf32, #tpu.memory_space<vmem>>
    %199 = tpu.memref_slice %arg5[%c9_i32_147] : memref<16x!tpu.dma_semaphore, #tpu.memory_space<semaphore_mem>> -> memref<1x!tpu.dma_semaphore, #tpu.memory_space<semaphore_mem>>
    %200 = tpu.memref_squeeze %199 : memref<1x!tpu.dma_semaphore, #tpu.memory_space<semaphore_mem>> -> memref<!tpu.dma_semaphore, #tpu.memory_space<semaphore_mem>>
    tpu.wait_dma2 semaphore(%200 : memref<!tpu.dma_semaphore, #tpu.memory_space<semaphore_mem>>) src(%197 : memref<1x32xf32, #tpu.memory_space<any>>) dst(%198 : memref<1x32xf32, #tpu.memory_space<vmem>>)
    %c10_i32_151 = arith.constant 10 : i32
    %c0_i32_152 = arith.constant 0 : i32
    %201 = tpu.memref_slice %arg2[%66, %c0_i32_152] : memref<128x32xf32, #tpu.memory_space<any>> -> memref<1x32xf32, #tpu.memory_space<any>>
    %c10_i32_153 = arith.constant 10 : i32
    %c0_i32_154 = arith.constant 0 : i32
    %202 = tpu.memref_slice %arg4[%c10_i32_153, %c0_i32_154] : memref<16x32xf32, #tpu.memory_space<vmem>> -> memref<1x32xf32, #tpu.memory_space<vmem>>
    %203 = tpu.memref_slice %arg5[%c10_i32_151] : memref<16x!tpu.dma_semaphore, #tpu.memory_space<semaphore_mem>> -> memref<1x!tpu.dma_semaphore, #tpu.memory_space<semaphore_mem>>
    %204 = tpu.memref_squeeze %203 : memref<1x!tpu.dma_semaphore, #tpu.memory_space<semaphore_mem>> -> memref<!tpu.dma_semaphore, #tpu.memory_space<semaphore_mem>>
    tpu.wait_dma2 semaphore(%204 : memref<!tpu.dma_semaphore, #tpu.memory_space<semaphore_mem>>) src(%201 : memref<1x32xf32, #tpu.memory_space<any>>) dst(%202 : memref<1x32xf32, #tpu.memory_space<vmem>>)
    %c11_i32_155 = arith.constant 11 : i32
    %c0_i32_156 = arith.constant 0 : i32
    %205 = tpu.memref_slice %arg2[%72, %c0_i32_156] : memref<128x32xf32, #tpu.memory_space<any>> -> memref<1x32xf32, #tpu.memory_space<any>>
    %c11_i32_157 = arith.constant 11 : i32
    %c0_i32_158 = arith.constant 0 : i32
    %206 = tpu.memref_slice %arg4[%c11_i32_157, %c0_i32_158] : memref<16x32xf32, #tpu.memory_space<vmem>> -> memref<1x32xf32, #tpu.memory_space<vmem>>
    %207 = tpu.memref_slice %arg5[%c11_i32_155] : memref<16x!tpu.dma_semaphore, #tpu.memory_space<semaphore_mem>> -> memref<1x!tpu.dma_semaphore, #tpu.memory_space<semaphore_mem>>
    %208 = tpu.memref_squeeze %207 : memref<1x!tpu.dma_semaphore, #tpu.memory_space<semaphore_mem>> -> memref<!tpu.dma_semaphore, #tpu.memory_space<semaphore_mem>>
    tpu.wait_dma2 semaphore(%208 : memref<!tpu.dma_semaphore, #tpu.memory_space<semaphore_mem>>) src(%205 : memref<1x32xf32, #tpu.memory_space<any>>) dst(%206 : memref<1x32xf32, #tpu.memory_space<vmem>>)
    %c12_i32_159 = arith.constant 12 : i32
    %c0_i32_160 = arith.constant 0 : i32
    %209 = tpu.memref_slice %arg2[%78, %c0_i32_160] : memref<128x32xf32, #tpu.memory_space<any>> -> memref<1x32xf32, #tpu.memory_space<any>>
    %c12_i32_161 = arith.constant 12 : i32
    %c0_i32_162 = arith.constant 0 : i32
    %210 = tpu.memref_slice %arg4[%c12_i32_161, %c0_i32_162] : memref<16x32xf32, #tpu.memory_space<vmem>> -> memref<1x32xf32, #tpu.memory_space<vmem>>
    %211 = tpu.memref_slice %arg5[%c12_i32_159] : memref<16x!tpu.dma_semaphore, #tpu.memory_space<semaphore_mem>> -> memref<1x!tpu.dma_semaphore, #tpu.memory_space<semaphore_mem>>
    %212 = tpu.memref_squeeze %211 : memref<1x!tpu.dma_semaphore, #tpu.memory_space<semaphore_mem>> -> memref<!tpu.dma_semaphore, #tpu.memory_space<semaphore_mem>>
    tpu.wait_dma2 semaphore(%212 : memref<!tpu.dma_semaphore, #tpu.memory_space<semaphore_mem>>) src(%209 : memref<1x32xf32, #tpu.memory_space<any>>) dst(%210 : memref<1x32xf32, #tpu.memory_space<vmem>>)
    %c13_i32_163 = arith.constant 13 : i32
    %c0_i32_164 = arith.constant 0 : i32
    %213 = tpu.memref_slice %arg2[%84, %c0_i32_164] : memref<128x32xf32, #tpu.memory_space<any>> -> memref<1x32xf32, #tpu.memory_space<any>>
    %c13_i32_165 = arith.constant 13 : i32
    %c0_i32_166 = arith.constant 0 : i32
    %214 = tpu.memref_slice %arg4[%c13_i32_165, %c0_i32_166] : memref<16x32xf32, #tpu.memory_space<vmem>> -> memref<1x32xf32, #tpu.memory_space<vmem>>
    %215 = tpu.memref_slice %arg5[%c13_i32_163] : memref<16x!tpu.dma_semaphore, #tpu.memory_space<semaphore_mem>> -> memref<1x!tpu.dma_semaphore, #tpu.memory_space<semaphore_mem>>
    %216 = tpu.memref_squeeze %215 : memref<1x!tpu.dma_semaphore, #tpu.memory_space<semaphore_mem>> -> memref<!tpu.dma_semaphore, #tpu.memory_space<semaphore_mem>>
    tpu.wait_dma2 semaphore(%216 : memref<!tpu.dma_semaphore, #tpu.memory_space<semaphore_mem>>) src(%213 : memref<1x32xf32, #tpu.memory_space<any>>) dst(%214 : memref<1x32xf32, #tpu.memory_space<vmem>>)
    %c14_i32_167 = arith.constant 14 : i32
    %c0_i32_168 = arith.constant 0 : i32
    %217 = tpu.memref_slice %arg2[%90, %c0_i32_168] : memref<128x32xf32, #tpu.memory_space<any>> -> memref<1x32xf32, #tpu.memory_space<any>>
    %c14_i32_169 = arith.constant 14 : i32
    %c0_i32_170 = arith.constant 0 : i32
    %218 = tpu.memref_slice %arg4[%c14_i32_169, %c0_i32_170] : memref<16x32xf32, #tpu.memory_space<vmem>> -> memref<1x32xf32, #tpu.memory_space<vmem>>
    %219 = tpu.memref_slice %arg5[%c14_i32_167] : memref<16x!tpu.dma_semaphore, #tpu.memory_space<semaphore_mem>> -> memref<1x!tpu.dma_semaphore, #tpu.memory_space<semaphore_mem>>
    %220 = tpu.memref_squeeze %219 : memref<1x!tpu.dma_semaphore, #tpu.memory_space<semaphore_mem>> -> memref<!tpu.dma_semaphore, #tpu.memory_space<semaphore_mem>>
    tpu.wait_dma2 semaphore(%220 : memref<!tpu.dma_semaphore, #tpu.memory_space<semaphore_mem>>) src(%217 : memref<1x32xf32, #tpu.memory_space<any>>) dst(%218 : memref<1x32xf32, #tpu.memory_space<vmem>>)
    %c15_i32_171 = arith.constant 15 : i32
    %c0_i32_172 = arith.constant 0 : i32
    %221 = tpu.memref_slice %arg2[%96, %c0_i32_172] : memref<128x32xf32, #tpu.memory_space<any>> -> memref<1x32xf32, #tpu.memory_space<any>>
    %c15_i32_173 = arith.constant 15 : i32
    %c0_i32_174 = arith.constant 0 : i32
    %222 = tpu.memref_slice %arg4[%c15_i32_173, %c0_i32_174] : memref<16x32xf32, #tpu.memory_space<vmem>> -> memref<1x32xf32, #tpu.memory_space<vmem>>
    %223 = tpu.memref_slice %arg5[%c15_i32_171] : memref<16x!tpu.dma_semaphore, #tpu.memory_space<semaphore_mem>> -> memref<1x!tpu.dma_semaphore, #tpu.memory_space<semaphore_mem>>
    %224 = tpu.memref_squeeze %223 : memref<1x!tpu.dma_semaphore, #tpu.memory_space<semaphore_mem>> -> memref<!tpu.dma_semaphore, #tpu.memory_space<semaphore_mem>>
    tpu.wait_dma2 semaphore(%224 : memref<!tpu.dma_semaphore, #tpu.memory_space<semaphore_mem>>) src(%221 : memref<1x32xf32, #tpu.memory_space<any>>) dst(%222 : memref<1x32xf32, #tpu.memory_space<vmem>>)
    %c0 = arith.constant 0 : index
    %c0_175 = arith.constant 0 : index
    %225 = vector.load %arg4[%c0, %c0_175] : memref<16x32xf32, #tpu.memory_space<vmem>>, vector<16x32xf32>
    %cst = arith.constant 5.65685415 : f32
    %226 = vector.broadcast %cst : f32 to vector<16x32xf32>
    %227 = arith.mulf %225, %226 : vector<16x32xf32>
    %c0_176 = arith.constant 0 : index
    %c0_177 = arith.constant 0 : index
    %228 = vector.load %arg3[%c0_176, %c0_177] : memref<16x32xf32, #tpu.memory_space<vmem>>, vector<16x32xf32>
    tpu.vector_store %arg3[%c0_176, %c0_177], %227 {strides = array<i32>} : memref<16x32xf32, #tpu.memory_space<vmem>>, vector<16x32xf32>,
    return
  }
  func.func @transform_1(%arg0: i32, %arg1: memref<16xi32, #tpu.memory_space<smem>>) -> (i32, i32) {
    %c0_i32 = arith.constant 0 : i32
    %c0_i32_0 = arith.constant 0 : i32
    return %arg0, %c0_i32 : i32, i32
  }
}

</mosaic_0001>

<bundles_post_ra>
// kernel: input_embedding.1
= control target key start
LH: loop header
LB: loop body
LE: loop exit
PB: predicated region body
PF: predicated region fallthrough
CT: control target
= control target key end

     0   :  { %s1637_s0 = inlined_call_operand.vmem [shape: s32[16], index: 0, kind: input, shape index: {}]   ;;  %s1638_s1 = inlined_call_operand.vmem [shape: f32[128,32], index: 1, kind: input, shape index: {}]   ;;  %s1639_s2 = inlined_call_operand.hbm [shape: f32[16,32], index: 2, kind: output, shape index: {}]  }
   0x1   :  { %s7_s11 = sshll.u32 %s1637_s0, 4  ;;  %s8_s11 = int_to_ptr.vmem [resolvable:$true] %s7_s11 }
   0x2   :  { %s1397_s12 = scalar_lea.vmem %s8_s11, 16  ;;  %p1402_p1 = scmp.lt.s32.totalorder %s8_s11, %s8_s11 }
   0x3   :  { %p1398_p0 = scmp.ne.s32.totalorder %s8_s11, %s1397_s12  ;;  %p1403_p2 = scmp.lt.s32.totalorder %s1397_s12, %s1397_s12 }
   0x5   :  { %p1404_p3 = por %p1403_p2, %p1402_p1 }
   0x7   :  { %p1405_p4 = pnand %p1404_p3, %p1398_p0 }
   0x9   :  { %1408 = shalt.err (!%p1405_p4)  }
   0xa   :  { %s1467_s13 = smov [#allocation5]  }
   0xb   :  { %10 = dma.vmem_to_smem %s8_s11, 16, %s1467_s13, [#allocation4] }
   0xc   :  { %1431 = dma.done.wait [#allocation4], 16 }
   0xd   :  { %1432 = vsyncadd [#allocation4], 4294967280 }
   0xe   :  { %12 = sfence }
   0xf   :  { %13 = vsyncpa [#allocation7], 0  ;;  %s17_s14 = sld [smem:[#allocation5]]  ;;  %s1255_s15 = sld [smem:[#allocation5 + $0x1]] }
  0x10   :  { %s1261_s16 = sld [smem:[#allocation5 + $0x2]]  ;;  %s1267_s17 = sld [smem:[#allocation5 + $0x3]] }
  0x11   :  { %s1489_s18 = sld [smem:[#allocation5 + $0x4]]  ;;  %s1491_s0 = sld [smem:[#allocation5 + $0x5]] }
  0x12   :  { %s1493_s19 = sld [smem:[#allocation5 + $0x6]]  ;;  %s1495_s20 = sld [smem:[#allocation5 + $0x7]] }
  0x13   :  { %s1497_s21 = sld [smem:[#allocation5 + $0x8]]  ;;  %s1499_s22 = sld [smem:[#allocation5 + $0x9]] }
  0x14   :  { %s1501_s23 = sld [smem:[#allocation5 + $0xa]]  ;;  %s1503_s24 = sld [smem:[#allocation5 + $0xb]] }
  0x15   :  { %p18_p5 = scmp.gt.s32.totalorder %s17_s14, 0  ;;  %p1250_p6 = scmp.lt.s32.totalorder %s17_s14, 127 }
  0x16   :  { %p26_p7 = scmp.gt.s32.totalorder %s1255_s15, 0  ;;  %p1256_p8 = scmp.lt.s32.totalorder %s1255_s15, 127 }
  0x17   :  { %s1641_s14 = smov (!%p18_p5, %s17_s14), 0  ;;  %p34_p9 = scmp.gt.s32.totalorder %s1261_s16, 0 }
  0x18   :  { %s1643_s15 = smov (!%p26_p7, %s1255_s15), 0  ;;  %s1645_s14 = smov (!%p1250_p6, %s1641_s14), 127 }
  0x19   :  { %s1647_s15 = smov (!%p1256_p8, %s1643_s15), 127  ;;  %p1262_p10 = scmp.lt.s32.totalorder %s1261_s16, 127 }
  0x1a   :  { %p42_p11 = scmp.gt.s32.totalorder %s1267_s17, 0  ;;  %p1268_p12 = scmp.lt.s32.totalorder %s1267_s17, 127 }
  0x1b   :  { %s1649_s16 = smov (!%p34_p9, %s1261_s16), 0  ;;  %p50_p13 = scmp.gt.s32.totalorder %s1489_s18, 0 }
  0x1c   :  { %s1651_s17 = smov (!%p42_p11, %s1267_s17), 0  ;;  %s1653_s16 = smov (!%p1262_p10, %s1649_s16), 127 }
  0x1d   :  { %s1655_s17 = smov (!%p1268_p12, %s1651_s17), 127  ;;  %p1274_p0 = scmp.lt.s32.totalorder %s1489_s18, 127 }
  0x1e   :  { %p58_p1 = scmp.gt.s32.totalorder %s1491_s0, 0  ;;  %p1280_p2 = scmp.lt.s32.totalorder %s1491_s0, 127 }
  0x1f   :  { %s1657_s18 = smov (!%p50_p13, %s1489_s18), 0  ;;  %p66_p3 = scmp.gt.s32.totalorder %s1493_s19, 0 }
  0x20   :  { %s1659_s0 = smov (!%p58_p1, %s1491_s0), 0  ;;  %s1661_s18 = smov (!%p1274_p0, %s1657_s18), 127 }
  0x21   :  { %s1663_s0 = smov (!%p1280_p2, %s1659_s0), 127  ;;  %p1286_p4 = scmp.lt.s32.totalorder %s1493_s19, 127 }
  0x22   :  { %p74_p5 = scmp.gt.s32.totalorder %s1495_s20, 0  ;;  %p1292_p6 = scmp.lt.s32.totalorder %s1495_s20, 127 }
  0x23   :  { %s1665_s19 = smov (!%p66_p3, %s1493_s19), 0  ;;  %p82_p7 = scmp.gt.s32.totalorder %s1497_s21, 0 }
  0x24   :  { %s1667_s20 = smov (!%p74_p5, %s1495_s20), 0  ;;  %s1669_s19 = smov (!%p1286_p4, %s1665_s19), 127 }
  0x25   :  { %s1671_s20 = smov (!%p1292_p6, %s1667_s20), 127  ;;  %p1298_p8 = scmp.lt.s32.totalorder %s1497_s21, 127 }
  0x26   :  { %p90_p9 = scmp.gt.s32.totalorder %s1499_s22, 0  ;;  %p1304_p10 = scmp.lt.s32.totalorder %s1499_s22, 127 }
  0x27   :  { %s1673_s21 = smov (!%p82_p7, %s1497_s21), 0  ;;  %p98_p11 = scmp.gt.s32.totalorder %s1501_s23, 0 }
  0x28   :  { %s1675_s22 = smov (!%p90_p9, %s1499_s22), 0  ;;  %s1677_s21 = smov (!%p1298_p8, %s1673_s21), 127 }
  0x29   :  { %s1679_s22 = smov (!%p1304_p10, %s1675_s22), 127  ;;  %p1310_p12 = scmp.lt.s32.totalorder %s1501_s23, 127 }
  0x2a   :  { %p106_p13 = scmp.gt.s32.totalorder %s1503_s24, 0  ;;  %p1316_p0 = scmp.lt.s32.totalorder %s1503_s24, 127 }
  0x2b   :  { %s1681_s23 = smov (!%p98_p11, %s1501_s23), 0  ;;  %s1321_s25 = sld [smem:[#allocation5 + $0xc]] }
  0x2c   :  { %s1683_s24 = smov (!%p106_p13, %s1503_s24), 0  ;;  %s1685_s23 = smov (!%p1310_p12, %s1681_s23), 127 }
  0x2d   :  { %s1687_s24 = smov (!%p1316_p0, %s1683_s24), 127  ;;  %s1327_s26 = sld [smem:[#allocation5 + $0xd]] }
  0x2e   :  { %s142_s29 = scalar_lea.vmem %s1638_s1, %s1645_s14  ;;  %s1333_s30 = sld [smem:[#allocation5 + $0xe]] }
  0x2f   :  { %v160_v0 = vld [vmem:[%s142_s29] sm:$0x1]  ;;  %s1339_s3 = sld [smem:[#allocation5 + $0xf]] }
  0x30   :  { %161 = vst [vmem:[#allocation2] sm:$0x1] %v160_v0 }
  0x31   :  { %p114_p1 = scmp.gt.s32.totalorder %s1321_s25, 0  ;;  %p1322_p2 = scmp.lt.s32.totalorder %s1321_s25, 127 }
  0x33   :  { %p122_p3 = scmp.gt.s32.totalorder %s1327_s26, 0  ;;  %p1328_p4 = scmp.lt.s32.totalorder %s1327_s26, 127 }
  0x34   :  { %s1689_s25 = smov (!%p114_p1, %s1321_s25), 0  ;;  %p130_p5 = scmp.gt.s32.totalorder %s1333_s30, 0 }
  0x35   :  { %s1691_s26 = smov (!%p122_p3, %s1327_s26), 0  ;;  %s1693_s25 = smov (!%p1322_p2, %s1689_s25), 127 }
  0x36   :  { %s1695_s26 = smov (!%p1328_p4, %s1691_s26), 127  ;;  %p1334_p6 = scmp.lt.s32.totalorder %s1333_s30, 127 }
  0x37   :  { %p138_p7 = scmp.gt.s32.totalorder %s1339_s3, 0  ;;  %p1340_p8 = scmp.lt.s32.totalorder %s1339_s3, 127 }
  0x38   :  { %s1697_s30 = smov (!%p130_p5, %s1333_s30), 0 }
  0x39   :  { %s1699_s3 = smov (!%p138_p7, %s1339_s3), 0  ;;  %s1701_s30 = smov (!%p1334_p6, %s1697_s30), 127 }
  0x3a   :  { %s1703_s3 = smov (!%p1340_p8, %s1699_s3), 127 }
  0x3b   :  { %186 = vsyncadd [#allocation3], 16  ;;  %s187_s6 = scalar_lea.vmem %s1638_s1, %s1647_s15 }
  0x3c   :  { %v207_v1 = vld [vmem:[%s187_s6] sm:$0x1] }
  0x3d   :  { %208 = vst [vmem:[#allocation2 + $0x1] sm:$0x1] %v207_v1 }
  0x3e   :  { %233 = vsyncadd [#allocation3 + $0x1], 16  ;;  %s234_s9 = scalar_lea.vmem %s1638_s1, %s1653_s16 }
  0x3f   :  { %v254_v2 = vld [vmem:[%s234_s9] sm:$0x1] }
  0x40   :  { %255 = vst [vmem:[#allocation2 + $0x2] sm:$0x1] %v254_v2 }
  0x41   :  { %280 = vsyncadd [#allocation3 + $0x2], 16  ;;  %s281_s12 = scalar_lea.vmem %s1638_s1, %s1655_s17 }
  0x42   :  { %v301_v3 = vld [vmem:[%s281_s12] sm:$0x1] }
  0x43   :  { %302 = vst [vmem:[#allocation2 + $0x3] sm:$0x1] %v301_v3 }
  0x44   :  { %327 = vsyncadd [#allocation3 + $0x3], 16  ;;  %s328_s15 = scalar_lea.vmem %s1638_s1, %s1661_s18 }
  0x45   :  { %v348_v4 = vld [vmem:[%s328_s15] sm:$0x1] }
  0x46   :  { %349 = vst [vmem:[#allocation2 + $0x4] sm:$0x1] %v348_v4 }
  0x47   :  { %374 = vsyncadd [#allocation3 + $0x4], 16  ;;  %s375_s28 = scalar_lea.vmem %s1638_s1, %s1663_s0 }
  0x48   :  { %v395_v5 = vld [vmem:[%s375_s28] sm:$0x1] }
  0x49   :  { %396 = vst [vmem:[#allocation2 + $0x5] sm:$0x1] %v395_v5 }
  0x4a   :  { %421 = vsyncadd [#allocation3 + $0x5], 16  ;;  %s422_s4 = scalar_lea.vmem %s1638_s1, %s1669_s19 }
  0x4b   :  { %v442_v6 = vld [vmem:[%s422_s4] sm:$0x1] }
  0x4c   :  { %443 = vst [vmem:[#allocation2 + $0x6] sm:$0x1] %v442_v6 }
  0x4d   :  { %468 = vsyncadd [#allocation3 + $0x6], 16  ;;  %s469_s6 = scalar_lea.vmem %s1638_s1, %s1671_s20 }
  0x4e   :  { %v489_v7 = vld [vmem:[%s469_s6] sm:$0x1] }
  0x4f   :  { %490 = vst [vmem:[#allocation2 + $0x7] sm:$0x1] %v489_v7 }
  0x50   :  { %515 = vsyncadd [#allocation3 + $0x7], 16  ;;  %s516_s8 = scalar_lea.vmem %s1638_s1, %s1677_s21 }
  0x51   :  { %v536_v8 = vld [vmem:[%s516_s8] sm:$0x1] }
  0x52   :  { %537 = vst [vmem:[#allocation2 + $0x8] sm:$0x1] %v536_v8 }
  0x53   :  { %562 = vsyncadd [#allocation3 + $0x8], 16  ;;  %s563_s10 = scalar_lea.vmem %s1638_s1, %s1679_s22 }
  0x54   :  { %v583_v9 = vld [vmem:[%s563_s10] sm:$0x1] }
  0x55   :  { %584 = vst [vmem:[#allocation2 + $0x9] sm:$0x1] %v583_v9 }
  0x56   :  { %609 = vsyncadd [#allocation3 + $0x9], 16  ;;  %s610_s12 = scalar_lea.vmem %s1638_s1, %s1685_s23 }
  0x57   :  { %v630_v10 = vld [vmem:[%s610_s12] sm:$0x1] }
  0x58   :  { %631 = vst [vmem:[#allocation2 + $0xa] sm:$0x1] %v630_v10 }
  0x59   :  { %656 = vsyncadd [#allocation3 + $0xa], 16  ;;  %s657_s14 = scalar_lea.vmem %s1638_s1, %s1687_s24 }
  0x5a   :  { %v677_v11 = vld [vmem:[%s657_s14] sm:$0x1] }
  0x5b   :  { %678 = vst [vmem:[#allocation2 + $0xb] sm:$0x1] %v677_v11 }
  0x5c   :  { %703 = vsyncadd [#allocation3 + $0xb], 16  ;;  %s704_s16 = scalar_lea.vmem %s1638_s1, %s1693_s25 }
  0x5d   :  { %v724_v12 = vld [vmem:[%s704_s16] sm:$0x1] }
  0x5e   :  { %725 = vst [vmem:[#allocation2 + $0xc] sm:$0x1] %v724_v12 }
  0x5f   :  { %750 = vsyncadd [#allocation3 + $0xc], 16  ;;  %s751_s28 = scalar_lea.vmem %s1638_s1, %s1695_s26 }
  0x60   :  { %v771_v13 = vld [vmem:[%s751_s28] sm:$0x1] }
  0x61   :  { %772 = vst [vmem:[#allocation2 + $0xd] sm:$0x1] %v771_v13 }
  0x62   :  { %797 = vsyncadd [#allocation3 + $0xd], 16  ;;  %s798_s29 = scalar_lea.vmem %s1638_s1, %s1701_s30 }
  0x63   :  { %v818_v14 = vld [vmem:[%s798_s29] sm:$0x1] }
  0x64   :  { %819 = vst [vmem:[#allocation2 + $0xe] sm:$0x1] %v818_v14 }
  0x65   :  { %844 = vsyncadd [#allocation3 + $0xe], 16  ;;  %s845_s18 = scalar_lea.vmem %s1638_s1, %s1703_s3 }
  0x66   :  { %v865_v15 = vld [vmem:[%s845_s18] sm:$0x1] }
  0x67   :  { %866 = vst [vmem:[#allocation2 + $0xf] sm:$0x1] %v865_v15 }
  0x68   :  { %891 = vsyncadd [#allocation3 + $0xf], 16 }
  0x69   :  { %1433 = dma.done.wait [#allocation3], 16 }
  0x6a   :  { %1434 = vsyncadd [#allocation3], 4294967280 }
  0x6b   :  { %1435 = dma.done.wait [#allocation3 + $0x1], 16 }
  0x6c   :  { %1436 = vsyncadd [#allocation3 + $0x1], 4294967280 }
  0x6d   :  { %1437 = dma.done.wait [#allocation3 + $0x2], 16 }
  0x6e   :  { %1438 = vsyncadd [#allocation3 + $0x2], 4294967280 }
  0x6f   :  { %1439 = dma.done.wait [#allocation3 + $0x3], 16 }
  0x70   :  { %1440 = vsyncadd [#allocation3 + $0x3], 4294967280 }
  0x71   :  { %1441 = dma.done.wait [#allocation3 + $0x4], 16 }
  0x72   :  { %1442 = vsyncadd [#allocation3 + $0x4], 4294967280 }
  0x73   :  { %1443 = dma.done.wait [#allocation3 + $0x5], 16 }
  0x74   :  { %1444 = vsyncadd [#allocation3 + $0x5], 4294967280 }
  0x75   :  { %1445 = dma.done.wait [#allocation3 + $0x6], 16 }
  0x76   :  { %1446 = vsyncadd [#allocation3 + $0x6], 4294967280 }
  0x77   :  { %1447 = dma.done.wait [#allocation3 + $0x7], 16 }
  0x78   :  { %1448 = vsyncadd [#allocation3 + $0x7], 4294967280 }
  0x79   :  { %1449 = dma.done.wait [#allocation3 + $0x8], 16 }
  0x7a   :  { %1450 = vsyncadd [#allocation3 + $0x8], 4294967280 }
  0x7b   :  { %1451 = dma.done.wait [#allocation3 + $0x9], 16 }
  0x7c   :  { %1452 = vsyncadd [#allocation3 + $0x9], 4294967280 }
  0x7d   :  { %1453 = dma.done.wait [#allocation3 + $0xa], 16 }
  0x7e   :  { %1454 = vsyncadd [#allocation3 + $0xa], 4294967280 }
  0x7f   :  { %1455 = dma.done.wait [#allocation3 + $0xb], 16 }
  0x80   :  { %1456 = vsyncadd [#allocation3 + $0xb], 4294967280 }
  0x81   :  { %1457 = dma.done.wait [#allocation3 + $0xc], 16 }
  0x82   :  { %1458 = vsyncadd [#allocation3 + $0xc], 4294967280 }
  0x83   :  { %1459 = dma.done.wait [#allocation3 + $0xd], 16 }
  0x84   :  { %1460 = vsyncadd [#allocation3 + $0xd], 4294967280 }
  0x85   :  { %1461 = dma.done.wait [#allocation3 + $0xe], 16 }
  0x86   :  { %1462 = vsyncadd [#allocation3 + $0xe], 4294967280 }
  0x87   :  { %1463 = dma.done.wait [#allocation3 + $0xf], 16 }
  0x88   :  { %1464 = vsyncadd [#allocation3 + $0xf], 4294967280  ;;  %s1468_s1 = smov [#allocation6]   ;;  %v925_v16 = vld [vmem:[#allocation2] sm:$0xff]  ;;  %vm929_vm0 = vcmask 261120   ;;  %v926_v17 = vld [vmem:[#allocation2 + $0x8] sm:$0xff] }
  0x89   :  { %s937_s26 = sshll.u32 %s1468_s1, 4  ;;  %v927_v18 = vmul.f32 5.656854, %v925_v16  ;;  %v928_v19 = vmul.f32 5.656854, %v926_v17  ;;  %s938_s26 = int_to_ptr.vmem [resolvable:$true] %s937_s26 }
  0x8a   :  { %s1409_s30 = scalar_lea.vmem %s938_s26, 256  ;;  %p1414_p10 = scmp.lt.s32.totalorder %s938_s26, %s938_s26 }
  0x8b   :  { %930 = vst.msk [vmem:[#allocation6] sm:$0xff] %vm929_vm0, %v927_v18  ;;  %931 = vst.msk [vmem:[#allocation6 + $0x8] sm:$0xff] %vm929_vm0, %v928_v19  ;;  %p1410_p9 = scmp.ne.s32.totalorder %s938_s26, %s1409_s30  ;;  %p1415_p11 = scmp.lt.s32.totalorder %s1409_s30, %s1409_s30 }
  0x8d   :  { %p1416_p12 = por %p1415_p11, %p1414_p10 }
  0x8f   :  { %p1417_p13 = pnand %p1416_p12, %p1410_p9 }
  0x91   :  { %1420 = shalt.err (!%p1417_p13)
}
  0x92   :  { %s1421_s6 = scalar_lea.hbm %s1639_s2, 256 }
  0x93   :  { %p1422_p0 = scmp.ne.s32.totalorder %s1639_s2, %s1421_s6  ;;  %p1425_p1 = scmp.lt.u32.totalorder %s1421_s6, %s1639_s2 }
  0x95   :  { %p1427_p2 = pnand %p1425_p1, %p1422_p0 }
  0x97   :  { %1430 = shalt.err (!%p1427_p2)
}
  0x98   :  { %s1469_s9 = smov 128   ;;  %s1470_s10 = smov 8  }
  0x99   :  { %943 = dma.vmem_to_hbm [thread:$0]  %s938_s26, 256, %s1639_s2, [#allocation7], %s1469_s9, %s1469_s9, %s1470_s10  }
  0x9a   :  { %1465 = dma.done.wait [#allocation7], 256  }
  0x9b   :  { %1466 = vsyncadd [#allocation7], 4294967040 }
  0x9c   :  { %947 = vsyncpa [#allocation7], 1 }
  0x9d   :  { %948 = vsyncmov [#allocation3] }
  0xa0   :  { %s949_s12 = vpop.sfrf %948 }
  0xa1   :  { %p1345_p3 = scmp.ne.s32.totalorder %s949_s12, 0 }
  0xa3   :  { %953 = shalt.err (%p1345_p3)  }
  0xa4   :  { %955 = vsyncmov [#allocation3 + $0x1] }
  0xa7   :  { %s956_s21 = vpop.sfrf %955 }
  0xa8   :  { %p1346_p4 = scmp.ne.s32.totalorder %s956_s21, 0 }
  0xaa   :  { %960 = shalt.err (%p1346_p4)  }
  0xab   :  { %962 = vsyncmov [#allocation3 + $0x2] }
  0xae   :  { %s963_s13 = vpop.sfrf %962 }
  0xaf   :  { %p1347_p5 = scmp.ne.s32.totalorder %s963_s13, 0 }
  0xb1   :  { %967 = shalt.err (%p1347_p5)  }
  0xb2   :  { %969 = vsyncmov [#allocation3 + $0x3] }
  0xb5   :  { %s970_s14 = vpop.sfrf %969 }
  0xb6   :  { %p1348_p6 = scmp.ne.s32.totalorder %s970_s14, 0 }
  0xb8   :  { %974 = shalt.err (%p1348_p6)  }
  0xb9   :  { %976 = vsyncmov [#allocation3 + $0x4] }
  0xbc   :  { %s977_s2 = vpop.sfrf %976 }
  0xbd   :  { %p1349_p7 = scmp.ne.s32.totalorder %s977_s2, 0 }
  0xbf   :  { %981 = shalt.err (%p1349_p7)  }
  0xc0   :  { %983 = vsyncmov [#allocation3 + $0x5] }
  0xc3   :  { %s984_s22 = vpop.sfrf %983 }
  0xc4   :  { %p1350_p8 = scmp.ne.s32.totalorder %s984_s22, 0 }
  0xc6   :  { %988 = shalt.err (%p1350_p8)  }
  0xc7   :  { %990 = vsyncmov [#allocation3 + $0x6] }
  0xca   :  { %s991_s15 = vpop.sfrf %990 }
  0xcb   :  { %p1351_p9 = scmp.ne.s32.totalorder %s991_s15, 0 }
  0xcd   :  { %995 = shalt.err (%p1351_p9)  }
  0xce   :  { %997 = vsyncmov [#allocation3 + $0x7] }
  0xd1   :  { %s998_s16 = vpop.sfrf %997 }
  0xd2   :  { %p1352_p10 = scmp.ne.s32.totalorder %s998_s16, 0 }
  0xd4   :  { %1002 = shalt.err (%p1352_p10)  }
  0xd5   :  { %1004 = vsyncmov [#allocation3 + $0x8] }
  0xd8   :  { %s1005_s23 = vpop.sfrf %1004 }
  0xd9   :  { %p1353_p11 = scmp.ne.s32.totalorder %s1005_s23, 0 }
  0xdb   :  { %1009 = shalt.err (%p1353_p11)  }
  0xdc   :  { %1011 = vsyncmov [#allocation3 + $0x9] }
  0xdf   :  { %s1012_s27 = vpop.sfrf %1011 }
  0xe0   :  { %p1354_p12 = scmp.ne.s32.totalorder %s1012_s27, 0 }
  0xe2   :  { %1016 = shalt.err (%p1354_p12)  }
  0xe3   :  { %1018 = vsyncmov [#allocation3 + $0xa] }
  0xe6   :  { %s1019_s28 = vpop.sfrf %1018 }
  0xe7   :  { %p1355_p13 = scmp.ne.s32.totalorder %s1019_s28, 0 }
  0xe9   :  { %1023 = shalt.err (%p1355_p13)  }
  0xea   :  { %1025 = vsyncmov [#allocation3 + $0xb] }
  0xed   :  { %s1026_s24 = vpop.sfrf %1025 }
  0xee   :  { %p1356_p0 = scmp.ne.s32.totalorder %s1026_s24, 0 }
  0xf0   :  { %1030 = shalt.err (%p1356_p0)  }
  0xf1   :  { %1032 = vsyncmov [#allocation3 + $0xc] }
  0xf4   :  { %s1033_s17 = vpop.sfrf %1032 }
  0xf5   :  { %p1357_p1 = scmp.ne.s32.totalorder %s1033_s17, 0 }
  0xf7   :  { %1037 = shalt.err (%p1357_p1)  }
  0xf8   :  { %1039 = vsyncmov [#allocation3 + $0xd] }
  0xfb   :  { %s1040_s29 = vpop.sfrf %1039 }
  0xfc   :  { %p1358_p2 = scmp.ne.s32.totalorder %s1040_s29, 0 }
  0xfe   :  { %1044 = shalt.err (%p1358_p2)  }
  0xff   :  { %1046 = vsyncmov [#allocation3 + $0xe] }
 0x102   :  { %s1047_s25 = vpop.sfrf %1046 }
 0x103   :  { %p1359_p3 = scmp.ne.s32.totalorder %s1047_s25, 0 }
 0x105   :  { %1051 = shalt.err (%p1359_p3)  }
 0x106   :  { %1053 = vsyncmov [#allocation3 + $0xf] }
 0x109   :  { %s1054_s4 = vpop.sfrf %1053 }
 0x10a   :  { %p1360_p4 = scmp.ne.s32.totalorder %s1054_s4, 0 }
 0x10c   :  { %1058 = shalt.err (%p1360_p4)  }

</bundles_post_ra>
